<compile_context>
chip_gen: v6e
topology: v6e:2x2x1
jax: 0.10.0
libtpu: 0.0.40
codegen_flags: <defaults>
</compile_context>

<pallas_src>
import jax
import jax.numpy as jnp
from jax.experimental import pallas as pl
from jax.experimental.pallas import tpu as pltpu


def cer_kernel(cls1_i_ref, cls1_j_ref, cls2_i_ref, cls2_j_ref,
               w1_ref, b1_ref, w2_ref, b2_ref, out_ref):
    # Da = (cls1_i + cls1_j) / 2 ; Db = (cls2_i + cls2_j) / 2
    da = (cls1_i_ref[...] + cls1_j_ref[...]) * 0.5       # [B, D]
    db = (cls2_i_ref[...] + cls2_j_ref[...]) * 0.5       # [B, D]

    # all_edit_encodings = cat((Da, Db), dim=0) -> one fused matmul chain.
    x = jnp.concatenate([da, db], axis=0)                 # [2B, D]

    # fc_edit_encoder = Linear(D, D) -> Tanh -> Linear(D, C) -> ReLU
    h = jnp.tanh(
        jnp.dot(x, w1_ref[...], preferred_element_type=jnp.float32)
        + b1_ref[...])
    out_ref[...] = jnp.maximum(
        jnp.dot(h, w2_ref[...], preferred_element_type=jnp.float32)
        + b2_ref[...], 0.0)                                # [2B, C_pad]


def custom_cer_forward(out1_i, out1_j, out2_i, out2_j, w1, b1, w2, b2):
    """out*_?: [B, S, D] encoder last_hidden_state.  Returns (Da_fc, Db_fc)."""
    B, S, D = out1_i.shape
    C = w2.shape[1]

    # Slice CLS rows outside the kernel: only [B, D] ever hits VMEM.
    cls1_i = out1_i[:, 0, :]
    cls1_j = out1_j[:, 0, :]
    cls2_i = out2_i[:, 0, :]
    cls2_j = out2_j[:, 0, :]

    # Lane-dense output: pad the projection dim up to a multiple of 128 with
    # zero columns (ReLU(0 + 0) = 0, so padding is inert) and slice after.
    c_pad = ((C + 127) // 128) * 128
    if c_pad != C:
        w2p = jnp.pad(w2, ((0, 0), (0, c_pad - C)))
        b2p = jnp.pad(b2, ((0, 0), (0, c_pad - C)))
    else:
        w2p, b2p = w2, b2

    vmem_spec = pl.BlockSpec(memory_space=pltpu.MemorySpace.VMEM)
    all_fc = pl.pallas_call(
        cer_kernel,
        out_shape=jax.ShapeDtypeStruct((2 * B, c_pad), jnp.float32),
        in_specs=[vmem_spec] * 8,
        out_specs=vmem_spec,
    )(cls1_i, cls1_j, cls2_i, cls2_j, w1, b1, w2p, b2p)

    all_fc = all_fc[:, :C]
    return all_fc[:B], all_fc[B:]


def reference_forward(out1_i, out1_j, out2_i, out2_j, w1, b1, w2, b2):
    """Pure-JAX reference matching the PyTorch forward semantics."""
    cls1_i = out1_i[:, 0, :]
    cls1_j = out1_j[:, 0, :]
    cls2_i = out2_i[:, 0, :]
    cls2_j = out2_j[:, 0, :]
    Da = (cls1_i + cls1_j) / 2.0
    Db = (cls2_i + cls2_j) / 2.0
    batch_size = Da.shape[0]
    all_edit = jnp.concatenate((Da, Db), axis=0)
    h = jnp.tanh(all_edit @ w1 + b1)
    all_fc = jnp.maximum(h @ w2 + b2, 0.0)
    return all_fc[:batch_size], all_fc[batch_size:]


if __name__ == "__main__":
    # Small, module-consistent shapes:
    #   batch=2, seq=8, embedding_size=128, code_change_vector_size=64
    B, S, D, C = 2, 8, 128, 64

    key = jax.random.PRNGKey(0)
    k1, k2, k3, k4, kw1, kb1, kw2, kb2 = jax.random.split(key, 8)

    out1_i = jax.random.normal(k1, (B, S, D), dtype=jnp.float32)
    out1_j = jax.random.normal(k2, (B, S, D), dtype=jnp.float32)
    out2_i = jax.random.normal(k3, (B, S, D), dtype=jnp.float32)
    out2_j = jax.random.normal(k4, (B, S, D), dtype=jnp.float32)

    # Deterministic parameter init for fc_edit_encoder (stored as [in, out]).
    w1 = jax.random.normal(kw1, (D, D), dtype=jnp.float32) * 0.05
    b1 = jax.random.normal(kb1, (1, D), dtype=jnp.float32) * 0.05
    w2 = jax.random.normal(kw2, (D, C), dtype=jnp.float32) * 0.05
    b2 = jax.random.normal(kb2, (1, C), dtype=jnp.float32) * 0.05

    da_fc, db_fc = custom_cer_forward(out1_i, out1_j, out2_i, out2_j,
                                      w1, b1, w2, b2)
    jax.block_until_ready((da_fc, db_fc))

    da_ref, db_ref = reference_forward(out1_i, out1_j, out2_i, out2_j,
                                       w1, b1, w2, b2)
    assert da_fc.shape == (B, C) and db_fc.shape == (B, C)
    assert jnp.allclose(da_fc, da_ref, atol=1e-5, rtol=1e-5)
    assert jnp.allclose(db_fc, db_ref, atol=1e-5, rtol=1e-5)

    print("KERNEL_OK")
</pallas_src>

<mosaic_0001>
module attributes {stable_mosaic.version = 11 : i64} {
  func.func @cer_kernel(%arg0: memref<2x128xf32, #tpu.memory_space<vmem>>, %arg1: memref<2x128xf32, #tpu.memory_space<vmem>>, %arg2: memref<2x128xf32, #tpu.memory_space<vmem>>, %arg3: memref<2x128xf32, #tpu.memory_space<vmem>>, %arg4: memref<128x128xf32, #tpu.memory_space<vmem>>, %arg5: memref<1x128xf32, #tpu.memory_space<vmem>>, %arg6: memref<128x128xf32, #tpu.memory_space<vmem>>, %arg7: memref<1x128xf32, #tpu.memory_space<vmem>>, %arg8: memref<4x128xf32, #tpu.memory_space<vmem>>) attributes {dimension_semantics = [], scalar_prefetch = 0 : i64, scratch_operands = 0 : i64, tpu.core_type = #tpu.core_type<tc>} {
    %c0 = arith.constant 0 : index
    %c0_0 = arith.constant 0 : index
    %0 = vector.load %arg0[%c0, %c0_0] : memref<2x128xf32, #tpu.memory_space<vmem>>, vector<2x128xf32>
    %c0_1 = arith.constant 0 : index
    %c0_2 = arith.constant 0 : index
    %1 = vector.load %arg1[%c0_1, %c0_2] : memref<2x128xf32, #tpu.memory_space<vmem>>, vector<2x128xf32>
    %2 = arith.addf %0, %1 : vector<2x128xf32>
    %cst = arith.constant 5.000000e-01 : f32
    %3 = vector.broadcast %cst : f32 to vector<2x128xf32>
    %4 = arith.mulf %2, %3 : vector<2x128xf32>
    %c0_3 = arith.constant 0 : index
    %c0_4 = arith.constant 0 : index
    %5 = vector.load %arg2[%c0_3, %c0_4] : memref<2x128xf32, #tpu.memory_space<vmem>>, vector<2x128xf32>
    %c0_5 = arith.constant 0 : index
    %c0_6 = arith.constant 0 : index
    %6 = vector.load %arg3[%c0_5, %c0_6] : memref<2x128xf32, #tpu.memory_space<vmem>>, vector<2x128xf32>
    %7 = arith.addf %5, %6 : vector<2x128xf32>
    %cst_7 = arith.constant 5.000000e-01 : f32
    %8 = vector.broadcast %cst_7 : f32 to vector<2x128xf32>
    %9 = arith.mulf %7, %8 : vector<2x128xf32>
    %10 = tpu.concatenate %4, %9 in 0 : vector<2x128xf32>, vector<2x128xf32> -> vector<4x128xf32>
    %c0_8 = arith.constant 0 : index
    %c0_9 = arith.constant 0 : index
    %11 = vector.load %arg4[%c0_8, %c0_9] : memref<128x128xf32, #tpu.memory_space<vmem>>, vector<128x128xf32>
    %cst_10 = arith.constant dense<0.000000e+00> : vector<4x128xf32>
    %12 = tpu.matmul %10, %11, %cst_10 {dimension_numbers = #tpu.dot_dimension_numbers<[1], [0], [0], [1], [0, 0, 1, 1], [], []>} : vector<4x128xf32>, vector<128x128xf32>, vector<4x128xf32> -> vector<4x128xf32>
    %c0_11 = arith.constant 0 : index
    %c0_12 = arith.constant 0 : index
    %13 = vector.load %arg5[%c0_11, %c0_12] : memref<1x128xf32, #tpu.memory_space<vmem>>, vector<1x128xf32>
    %14 = vector.broadcast %13 : vector<1x128xf32> to vector<4x128xf32>
    %15 = arith.addf %12, %14 : vector<4x128xf32>
    %16 = math.tanh %15 : vector<4x128xf32>
    %c0_13 = arith.constant 0 : index
    %c0_14 = arith.constant 0 : index
    %17 = vector.load %arg6[%c0_13, %c0_14] : memref<128x128xf32, #tpu.memory_space<vmem>>, vector<128x128xf32>
    %cst_15 = arith.constant dense<0.000000e+00> : vector<4x128xf32>
    %18 = tpu.matmul %16, %17, %cst_15 {dimension_numbers = #tpu.dot_dimension_numbers<[1], [0], [0], [1], [0, 0, 1, 1], [], []>} : vector<4x128xf32>, vector<128x128xf32>, vector<4x128xf32> -> vector<4x128xf32>
    %c0_16 = arith.constant 0 : index
    %c0_17 = arith.constant 0 : index
    %19 = vector.load %arg7[%c0_16, %c0_17] : memref<1x128xf32, #tpu.memory_space<vmem>>, vector<1x128xf32>
    %20 = vector.broadcast %19 : vector<1x128xf32> to vector<4x128xf32>
    %21 = arith.addf %18, %20 : vector<4x128xf32>
    %cst_18 = arith.constant 0.000000e+00 : f32
    %22 = vector.broadcast %cst_18 : f32 to vector<4x128xf32>
    %23 = arith.maximumf %21, %22 : vector<4x128xf32>
    %c0_19 = arith.constant 0 : index
    %c0_20 = arith.constant 0 : index
    %24 = vector.load %arg8[%c0_19, %c0_20] : memref<4x128xf32, #tpu.memory_space<vmem>>, vector<4x128xf32>
    tpu.vector_store %arg8[%c0_19, %c0_20], %23 {strides = array<i32>} : memref<4x128xf32, #tpu.memory_space<vmem>>, vector<4x128xf32>,
    return
  }
}

</mosaic_0001>

<bundles_post_ra>
// kernel: tpu_custom_call.1
= control target key start
LH: loop header
LB: loop body
LE: loop exit
PB: predicated region body
PF: predicated region fallthrough
CT: control target
= control target key end

     0   :  { %13 = vsyncpa [#allocation3], 0  ;;  %s640_s0 = inlined_call_operand.hbm [shape: f32[2,128], index: 0, kind: input, shape index: {}]   ;;  %s641_s1 = inlined_call_operand.hbm [shape: f32[2,128], index: 1, kind: input, shape index: {}]   ;;  %s642_s2 = inlined_call_operand.vmem [shape: f32[2,128], index: 2, kind: input, shape index: {}]   ;;  %s643_s3 = inlined_call_operand.vmem [shape: f32[2,128], index: 3, kind: input, shape index: {}]   ;;  %s644_s4 = inlined_call_operand.hbm [shape: f32[128,128], index: 4, kind: input, shape index: {}]   ;;  %s645_s5 = inlined_call_operand.vmem [shape: f32[1,128], index: 5, kind: input, shape index: {}]   ;;  %s646_s6 = inlined_call_operand.hbm [shape: f32[128,128], index: 6, kind: input, shape index: {}]   ;;  %s647_s7 = inlined_call_operand.vmem [shape: f32[1,128], index: 7, kind: input, shape index: {}]   ;;  %s648_s8 = inlined_call_operand.hbm [shape: f32[4,128], index: 8, kind: output, shape index: {}]  }
   0x1   :  { %14 = vsyncpa [#allocation6], 0 }
   0x2   :  { %15 = vsyncpa [#allocation9], 0 }
   0x3   :  { %16 = vsyncpa [#allocation4], 0  ;;  %s525_s27 = smov [#allocation5]   ;;  %s526_s29 = smov [#allocation2]  }
   0x4   :  { %s33_s28 = sshll.u32 %s525_s27, 4  ;;  %s23_s30 = sshll.u32 %s526_s29, 4  ;;  %s34_s28 = int_to_ptr.vmem [resolvable:$true] %s33_s28  ;;  %s24_s30 = int_to_ptr.vmem [resolvable:$true] %s23_s30 }
   0x5   :  { %s425_s9 = scalar_lea.vmem %s34_s28, 32  ;;  %p430_p1 = scmp.lt.s32.totalorder %s34_s28, %s34_s28 }
   0x6   :  { %p426_p0 = scmp.ne.s32.totalorder %s34_s28, %s425_s9  ;;  %p431_p2 = scmp.lt.s32.totalorder %s425_s9, %s425_s9 }
   0x8   :  { %p432_p3 = por %p431_p2, %p430_p1 }
   0xa   :  { %p433_p4 = pnand %p432_p3, %p426_p0 }
   0xc   :  { %436 = shalt.err (!%p433_p4)
}
   0xd   :  { %36 = dma.hbm_to_vmem [thread:$0]  %s641_s1, 32, %s34_s28, [#allocation6]  }
   0xe   :  { %s445_s12 = scalar_lea.vmem %s24_s30, 32  ;;  %p450_p6 = scmp.lt.s32.totalorder %s24_s30, %s24_s30 }
   0xf   :  { %p446_p5 = scmp.ne.s32.totalorder %s24_s30, %s445_s12  ;;  %p451_p7 = scmp.lt.s32.totalorder %s445_s12, %s445_s12 }
  0x11   :  { %p452_p8 = por %p451_p7, %p450_p6 }
  0x13   :  { %p453_p9 = pnand %p452_p8, %p446_p5 }
  0x15   :  { %456 = shalt.err (!%p453_p9)
}
  0x16   :  { %26 = dma.hbm_to_vmem [thread:$0]  %s640_s0, 32, %s24_s30, [#allocation3]  }
  0x17   :  { %s527_s15 = smov [#allocation7]  }
  0x18   :  { %s46_s16 = sshll.u32 %s527_s15, 4  ;;  %s47_s16 = int_to_ptr.vmem [resolvable:$true] %s46_s16 }
  0x19   :  { %s465_s17 = scalar_lea.vmem %s47_s16, 2048  ;;  %p470_p11 = scmp.lt.s32.totalorder %s47_s16, %s47_s16 }
  0x1a   :  { %p466_p10 = scmp.ne.s32.totalorder %s47_s16, %s465_s17  ;;  %p471_p12 = scmp.lt.s32.totalorder %s465_s17, %s465_s17 }
  0x1c   :  { %p472_p13 = por %p471_p12, %p470_p11 }
  0x1e   :  { %p473_p0 = pnand %p472_p13, %p466_p10 }
  0x20   :  { %476 = shalt.err (!%p473_p0)
}
  0x21   :  { %s528_s1 = smov 128   ;;  %s529_s18 = smov 8  }
  0x22   :  { %52 = dma.hbm_to_vmem [thread:$0]  %s644_s4, 2048, %s47_s16, [#allocation6], %s528_s1, %s528_s1, %s529_s18  }
  0x23   :  { %s530_s21 = smov [#allocation8]  }
  0x24   :  { %s60_s22 = sshll.u32 %s530_s21, 4  ;;  %s61_s22 = int_to_ptr.vmem [resolvable:$true] %s60_s22 }
  0x25   :  { %s485_s0 = scalar_lea.vmem %s61_s22, 2048  ;;  %p490_p2 = scmp.lt.s32.totalorder %s61_s22, %s61_s22 }
  0x26   :  { %p486_p1 = scmp.ne.s32.totalorder %s61_s22, %s485_s0  ;;  %p491_p3 = scmp.lt.s32.totalorder %s485_s0, %s485_s0 }
  0x28   :  { %p492_p4 = por %p491_p3, %p490_p2 }
  0x2a   :  { %p493_p5 = pnand %p492_p4, %p486_p1 }
  0x2c   :  { %496 = shalt.err (!%p493_p5)
}
  0x2d   :  { %66 = dma.hbm_to_vmem [thread:$0]  %s646_s6, 2048, %s61_s22, [#allocation9], %s528_s1, %s528_s1, %s529_s18  }
  0x2e   :  { %517 = dma.done.wait [#allocation3], 32  }
  0x2f   :  { %518 = vsyncadd [#allocation3], 4294967264 }
  0x30   :  { %519 = dma.done.wait [#allocation6], 2080  }
  0x31   :  { %520 = vsyncadd [#allocation6], 4294965216 }
  0x32   :  { %521 = dma.done.wait [#allocation9], 2048  }
  0x33   :  { %522 = vsyncadd [#allocation9], 4294965248  ;;  %v531_v0 = vmov 0.0   ;;  %vm532_vm0 = vmmov 0   ;;  %v109_v1 = vld [vmem:[#allocation7 + $0x78] sm:$0xff]  ;;  %v108_v2 = vld [vmem:[#allocation7 + $0x70] sm:$0xff] }
  0x34   :  { %336 = vmatprep.subr.mxu0 %v531_v0  ;;  %368 = vmatprep.mubr.msk.f32.mxu0 %vm532_vm0, %v531_v0  ;;  %v107_v3 = vld [vmem:[#allocation7 + $0x68] sm:$0xff]  ;;  %v106_v4 = vld [vmem:[#allocation7 + $0x60] sm:$0xff]  ;;  %v105_v5 = vld [vmem:[#allocation7 + $0x58] sm:$0xff]  ;;  %vm92_vm1 = vcmask 1041408   ;;  %s533_s29 = smov [#allocation10]  }
  0x35   :  { %371 = vmatprep.subr.mxu1 %v531_v0  ;;  %403 = vmatprep.mubr.msk.f32.mxu1 %vm532_vm0, %v531_v0  ;;  %v203_v6 = vld [vmem:[#allocation8 + $0x78] sm:$0xff]  ;;  %v202_v7 = vld [vmem:[#allocation8 + $0x70] sm:$0xff]  ;;  %v201_v9 = vld [vmem:[#allocation8 + $0x68] sm:$0xff]  ;;  %s289_s30 = sshll.u32 %s533_s29, 4  ;;  %s290_s30 = int_to_ptr.vmem [resolvable:$true] %s289_s30 }
  0x36   :  { %337 = vmatpush3.msra.mxu0 %v109_v1  ;;  %372 = vmatpush3.msra.mxu1 %v203_v6  ;;  %v104_v8 = vld [vmem:[#allocation7 + $0x50] sm:$0xff]  ;;  %v103_v10 = vld [vmem:[#allocation7 + $0x48] sm:$0xff]  ;;  %v200_v11 = vld [vmem:[#allocation8 + $0x60] sm:$0xff]  ;;  %s497_s9 = scalar_lea.vmem %s290_s30, 64  ;;  %p502_p7 = scmp.lt.s32.totalorder %s290_s30, %s290_s30 }
  0x37   :  { %338 = vmatprep.subr.mxu0 %v531_v0  ;;  %373 = vmatprep.subr.mxu1 %v531_v0  ;;  %v102_v12 = vld [vmem:[#allocation7 + $0x40] sm:$0xff]  ;;  %v199_v13 = vld [vmem:[#allocation8 + $0x58] sm:$0xff]  ;;  %v198_v17 = vld [vmem:[#allocation8 + $0x50] sm:$0xff]  ;;  %p498_p6 = scmp.ne.s32.totalorder %s290_s30, %s497_s9  ;;  %p503_p8 = scmp.lt.s32.totalorder %s497_s9, %s497_s9 }
  0x38   :  { %339 = vmatpush3.msra.mxu0 %v108_v2  ;;  %374 = vmatpush3.msra.mxu1 %v202_v7  ;;  %v101_v14 = vld [vmem:[#allocation7 + $0x38] sm:$0xff]  ;;  %v100_v18 = vld [vmem:[#allocation7 + $0x30] sm:$0xff]  ;;  %v197_v19 = vld [vmem:[#allocation8 + $0x48] sm:$0xff] }
  0x39   :  { %340 = vmatprep.subr.mxu0 %v531_v0  ;;  %375 = vmatprep.subr.mxu1 %v531_v0  ;;  %v85_v15 = vld [vmem:[%s642_s2] sm:$0x3]  ;;  %v99_v21 = vld [vmem:[#allocation7 + $0x28] sm:$0xff]  ;;  %v82_v23 = vld [vmem:[#allocation5] sm:$0x3]  ;;  %p504_p9 = por %p503_p8, %p502_p7 }
  0x3a   :  { %341 = vmatpush3.msra.mxu0 %v107_v3  ;;  %376 = vmatpush3.msra.mxu1 %v201_v9  ;;  %v86_v16 = vld [vmem:[%s643_s3] sm:$0x3]  ;;  %v98_v24 = vld [vmem:[#allocation7 + $0x20] sm:$0xff]  ;;  %v96_v28 = vld [vmem:[#allocation7 + $0x10] sm:$0xff] }
  0x3b   :  { %342 = vmatprep.subr.mxu0 %v531_v0  ;;  %377 = vmatprep.subr.mxu1 %v531_v0  ;;  %v87_v20 = vadd.f32 %v86_v16, %v85_v15  ;;  %v81_v22 = vld [vmem:[#allocation2] sm:$0x3]  ;;  %v95_v31 = vld [vmem:[#allocation7 + $0x8] sm:$0xff]  ;;  %v94_v32 = vld [vmem:[#allocation7] sm:$0xff]  ;;  %p505_p10 = pnand %p504_p9, %p498_p6 }
  0x3c   :  { %343 = vmatpush3.msra.mxu0 %v106_v4  ;;  %378 = vmatpush3.msra.mxu1 %v200_v11  ;;  %v83_v25 = vadd.f32 %v82_v23, %v81_v22  ;;  %v97_v27 = vld [vmem:[#allocation7 + $0x18] sm:$0xff]  ;;  %v196_v34 = vld [vmem:[#allocation8 + $0x40] sm:$0xff]  ;;  %v194_v36 = vld [vmem:[#allocation8 + $0x30] sm:$0xff] }
  0x3d   :  { %344 = vmatprep.subr.mxu0 %v531_v0  ;;  %379 = vmatprep.subr.mxu1 %v531_v0  ;;  %v88_v26 = vmul.f32 0.5, %v87_v20  ;;  %v195_v35 = vld [vmem:[#allocation8 + $0x38] sm:$0xff]  ;;  %v193_v37 = vld [vmem:[#allocation8 + $0x28] sm:$0xff]  ;;  %v192_v38 = vld [vmem:[#allocation8 + $0x20] sm:$0xff] }
  0x3e   :  { %345 = vmatpush3.msra.mxu0 %v105_v5  ;;  %380 = vmatpush3.msra.mxu1 %v199_v13  ;;  %v84_v29 = vmul.f32 0.5, %v83_v25  ;;  %v191_v39 = vld [vmem:[#allocation8 + $0x18] sm:$0xff]  ;;  %v190_v40 = vld [vmem:[#allocation8 + $0x10] sm:$0xff]  ;;  %v189_v41 = vld [vmem:[#allocation8 + $0x8] sm:$0xff] }
  0x3f   :  { %346 = vmatprep.subr.mxu0 %v531_v0  ;;  %381 = vmatprep.subr.mxu1 %v531_v0  ;;  %v90_v30 = vrot.slane %v88_v26, 6  ;;  %v188_v42 = vld [vmem:[#allocation8] sm:$0xff]  ;;  %v300_v43 = vld [vmem:[%s645_s5] ss:$0 sm:$0xff] }
  0x40   :  { %347 = vmatpush3.msra.mxu0 %v104_v8  ;;  %382 = vmatpush3.msra.mxu1 %v198_v17  ;;  %v301_v48 = vld [vmem:[%s647_s7] ss:$0 sm:$0xff] }
  0x41   :  { %348 = vmatprep.subr.mxu0 %v531_v0  ;;  %383 = vmatprep.subr.mxu1 %v531_v0  ;;  %v93_v33 = vsel %vm92_vm1, %v84_v29, %v90_v30 }
  0x42   :  { %349 = vmatpush3.msra.mxu0 %v103_v10  ;;  %384 = vmatpush3.msra.mxu1 %v197_v19 }
  0x43   :  { %350 = vmatprep.subr.mxu0 %v531_v0  ;;  %385 = vmatprep.subr.mxu1 %v531_v0 }
  0x44   :  { %351 = vmatpush3.msra.mxu0 %v102_v12  ;;  %386 = vmatpush3.msra.mxu1 %v196_v34 }
  0x45   :  { %352 = vmatprep.subr.mxu0 %v531_v0  ;;  %387 = vmatprep.subr.mxu1 %v531_v0 }
  0x46   :  { %353 = vmatpush3.msra.mxu0 %v101_v14  ;;  %388 = vmatpush3.msra.mxu1 %v195_v35 }
  0x47   :  { %354 = vmatprep.subr.mxu0 %v531_v0  ;;  %389 = vmatprep.subr.mxu1 %v531_v0 }
  0x48   :  { %355 = vmatpush3.msra.mxu0 %v100_v18  ;;  %390 = vmatpush3.msra.mxu1 %v194_v36 }
  0x49   :  { %356 = vmatprep.subr.mxu0 %v531_v0  ;;  %391 = vmatprep.subr.mxu1 %v531_v0 }
  0x4a   :  { %357 = vmatpush3.msra.mxu0 %v99_v21  ;;  %392 = vmatpush3.msra.mxu1 %v193_v37 }
  0x4b   :  { %358 = vmatprep.subr.mxu0 %v531_v0  ;;  %393 = vmatprep.subr.mxu1 %v531_v0 }
  0x4c   :  { %359 = vmatpush3.msra.mxu0 %v98_v24  ;;  %394 = vmatpush3.msra.mxu1 %v192_v38 }
  0x4d   :  { %360 = vmatprep.subr.mxu0 %v531_v0  ;;  %395 = vmatprep.subr.mxu1 %v531_v0 }
  0x4e   :  { %361 = vmatpush3.msra.mxu0 %v97_v27  ;;  %396 = vmatpush3.msra.mxu1 %v191_v39 }
  0x4f   :  { %362 = vmatprep.subr.mxu0 %v531_v0  ;;  %397 = vmatprep.subr.mxu1 %v531_v0 }
  0x50   :  { %363 = vmatpush3.msra.mxu0 %v96_v28  ;;  %398 = vmatpush3.msra.mxu1 %v190_v40 }
  0x51   :  { %364 = vmatprep.subr.mxu0 %v531_v0  ;;  %399 = vmatprep.subr.mxu1 %v531_v0 }
  0x52   :  { %365 = vmatpush3.msra.mxu0 %v95_v31  ;;  %400 = vmatpush3.msra.mxu1 %v189_v41 }
  0x53   :  { %366 = vmatprep.subr.mxu0 %v531_v0  ;;  %401 = vmatprep.subr.mxu1 %v531_v0 }
  0x54   :  { %367 = vmatpush3.msra.mxu0 %v94_v32  ;;  %402 = vmatpush3.msra.mxu1 %v188_v42 }
  0x55   :  { %369 = vmatmul.mubr.f32.vlgmr.msra.gmra.mxu0 %v93_v33 }
 0x115   :  { %v183_v44 = vpop.f32.mrf.mxu0 }
 0x116   :  { %v184_v45 = vadd.f32 %v300_v43, %v183_v44 }
 0x117   :  { %v370_v46 = vpop.f32.mrf.mxu0 }
 0x118   :  { %415 = vtanh.f32 %v184_v45 }
 0x125   :  { %v416_v47 = vpop.eup %415 }
 0x126   :  { %404 = vmatmul.mubr.f32.vlgmr.msra.gmra.mxu1 %v416_v47 }
 0x1e6   :  { %v277_v49 = vpop.f32.mrf.mxu1 }
 0x1e7   :  { %v278_v50 = vadd.f32 %v301_v48, %v277_v49 }
 0x1e8   :  { %v405_v51 = vpop.f32.mrf.mxu1 }
 0x1e9   :  { %v281_v52 = vmax.f32 %v278_v50, 0.0 }
 0x1eb   :  { %282 = vst [vmem:[#allocation10] sm:$0xf] %v281_v52 }
 0x1ec   :  { %508 = shalt.err (!%p505_p10)
}
 0x1ed   :  { %292 = dma.vmem_to_hbm [thread:$0]  %s290_s30, 64, %s648_s8, [#allocation4]  }
 0x1ee   :  { %523 = dma.done.wait [#allocation4], 64  }
 0x1ef   :  { %524 = vsyncadd [#allocation4], 4294967232 }
 0x1f0   :  { %296 = vsyncpa [#allocation3], 1 }
 0x1f1   :  { %297 = vsyncpa [#allocation6], 1 }
 0x1f2   :  { %298 = vsyncpa [#allocation9], 1 }
 0x1f3   :  { %299 = vsyncpa [#allocation4], 1 }

</bundles_post_ra>
